<compile_context>
chip_gen: v7x
topology: tpu7x:2x2x1
jax: 0.10.0
libtpu: 0.0.40
codegen_flags: <defaults>
</compile_context>

<pallas_src>
import functools

import numpy as np

import jax
import jax.numpy as jnp
from jax.experimental import pallas as pl
from jax.experimental.pallas import tpu as pltpu


# ----------------------------------------------------------------------------
# Fused backbone kernel: patch-embed + all residual blocks + hook capture
# ----------------------------------------------------------------------------
def _fused_backbone_kernel(
    hook_slot_ref,                     # SMEM (L,) int32: hook slot or -1
    p_ref,                             # (rt, K)   bf16 flattened patches
    wpe_ref, bpe_ref,                  # (K, D) bf16, (1, D) f32
    g_ref, beta_ref,                   # (1, 1, D) f32 LN params
    w1_ref, b1_ref,                    # (1, D, H) bf16, (1, 1, H) f32
    w2_ref, b2_ref,                    # (1, H, D) bf16, (1, 1, D) f32
    feats_ref,                         # out: (num_hooks, rt, D) f32
    tok_ref,                           # scratch: (rt, D) f32 resident tokens
):
    l = pl.program_id(1)               # block index (innermost, "arbitrary")

    # Patch-embedding projection, computed once per row tile (block 0).
    @pl.when(l == 0)
    def _():
        tok_ref[...] = (
            jnp.dot(p_ref[...], wpe_ref[...], preferred_element_type=jnp.float32)
            + bpe_ref[...]
        )

    x = tok_ref[...]                   # (rt, D) f32, resident across blocks

    # LayerNorm over the feature (lane) axis: var = E[x^2] - mu^2 (one pass).
    mu = jnp.mean(x, axis=-1, keepdims=True)
    var = jnp.maximum(jnp.mean(x * x, axis=-1, keepdims=True) - mu * mu, 0.0)
    ln = (x - mu) * jax.lax.rsqrt(var + 1e-5) * g_ref[0] + beta_ref[0]

    # MLP: two bf16 MXU matmuls with f32 accumulation; GELU in f32 on VPU/EUP.
    h = (
        jnp.dot(ln.astype(jnp.bfloat16), w1_ref[0],
                preferred_element_type=jnp.float32)
        + b1_ref[0]
    )
    h = jax.nn.gelu(h, approximate=True)
    y = (
        jnp.dot(h.astype(jnp.bfloat16), w2_ref[0],
                preferred_element_type=jnp.float32)
        + b2_ref[0]
    )

    new_tok = x + y
    tok_ref[...] = new_tok

    # Emulated forward hook: write this block's output into its hook slot.
    slot = hook_slot_ref[l]

    @pl.when(slot >= 0)
    def _():
        feats_ref[slot] = new_tok


def _pick_row_tile(n, cap=256):
    """Full slab when small, otherwise the largest 8-aligned divisor <= cap."""
    if n <= cap:
        return n
    for rt in range(cap, 7, -8):
        if n % rt == 0:
            return rt
    return n


def fused_backbone(patches, params, *, layers_to_extract):
    """Run patch-embed + all blocks in one pallas_call; return hook features.

    patches: (N, K) bf16 flattened patches, N = B * num_patches
    returns: (num_hooks, N, D) f32, ordered by sorted(layers_to_extract)
    """
    n, k_in = patches.shape
    num_blocks = params["w1"].shape[0]
    d = params["w_pe"].shape[1]
    hid = params["w1"].shape[2]

    hooks = tuple(sorted(layers_to_extract))
    num_hooks = len(hooks)

    rt = _pick_row_tile(n)
    assert n % rt == 0

    # Block index -> hook output slot (-1 for non-hook blocks); scalar-prefetched.
    slot_map = np.full((num_blocks,), -1, dtype=np.int32)
    for s, idx in enumerate(hooks):
        slot_map[idx] = s
    hook_slot = jnp.asarray(slot_map)

    grid = (n // rt, num_blocks)       # (parallel row tiles, sequential blocks)

    return pl.pallas_call(
        _fused_backbone_kernel,
        out_shape=jax.ShapeDtypeStruct((num_hooks, n, d), jnp.float32),
        grid_spec=pltpu.PrefetchScalarGridSpec(
            num_scalar_prefetch=1,
            grid=grid,
            in_specs=[
                pl.BlockSpec((rt, k_in), lambda r, l, hs: (r, 0)),      # patches
                pl.BlockSpec((k_in, d), lambda r, l, hs: (0, 0)),       # W_pe
                pl.BlockSpec((1, d), lambda r, l, hs: (0, 0)),          # b_pe
                pl.BlockSpec((1, 1, d), lambda r, l, hs: (l, 0, 0)),    # gamma
                pl.BlockSpec((1, 1, d), lambda r, l, hs: (l, 0, 0)),    # beta
                pl.BlockSpec((1, d, hid), lambda r, l, hs: (l, 0, 0)),  # W1
                pl.BlockSpec((1, 1, hid), lambda r, l, hs: (l, 0, 0)),  # b1
                pl.BlockSpec((1, hid, d), lambda r, l, hs: (l, 0, 0)),  # W2
                pl.BlockSpec((1, 1, d), lambda r, l, hs: (l, 0, 0)),    # b2
            ],
            # Constant block index across the l axis -> hook output buffer is
            # resident in VMEM for the whole block stack of a row tile and is
            # written back to HBM once per row tile.
            out_specs=pl.BlockSpec((num_hooks, rt, d), lambda r, l, hs: (0, r, 0)),
            scratch_shapes=[pltpu.VMEM((rt, d), jnp.float32)],
        ),
        compiler_params=pltpu.CompilerParams(
            # Row axis is independent -> megacore-shardable on v7x; block axis
            # carries state (token scratch + hook buffer) -> arbitrary.
            dimension_semantics=("parallel", "arbitrary"),
        ),
    )(hook_slot, patches,
      params["w_pe"], params["b_pe"],
      params["gamma"], params["beta"],
      params["w1"], params["b1"], params["w2"], params["b2"])


# ----------------------------------------------------------------------------
# Synthetic backbone parameters (deterministic init, stacked per-block)
# ----------------------------------------------------------------------------
def init_params(key, c, patch_size, embed_dim, hidden_dim, num_blocks):
    k_in = c * patch_size * patch_size
    ks = jax.random.split(key, 6)
    return {
        # MXU operands stored as bf16 (halves weight DMA + VMEM footprint).
        "w_pe": (jax.random.normal(ks[0], (k_in, embed_dim), jnp.float32)
                 * 0.02).astype(jnp.bfloat16),
        "b_pe": jax.random.normal(ks[1], (1, embed_dim), jnp.float32) * 0.02,
        "gamma": jnp.ones((num_blocks, 1, embed_dim), jnp.float32),
        "beta": jnp.zeros((num_blocks, 1, embed_dim), jnp.float32),
        "w1": (jax.random.normal(ks[2], (num_blocks, embed_dim, hidden_dim),
                                 jnp.float32) * 0.02).astype(jnp.bfloat16),
        "b1": jax.random.normal(ks[3], (num_blocks, 1, hidden_dim),
                                jnp.float32) * 0.02,
        "w2": (jax.random.normal(ks[4], (num_blocks, hidden_dim, embed_dim),
                                 jnp.float32) * 0.02).astype(jnp.bfloat16),
        "b2": jax.random.normal(ks[5], (num_blocks, 1, embed_dim),
                                jnp.float32) * 0.02,
    }


# ----------------------------------------------------------------------------
# Forward pass of multi_layer_feature_extractor
# ----------------------------------------------------------------------------
@functools.partial(
    jax.jit, static_argnames=("patch_size", "layers_to_extract", "input_shape")
)
def feature_extractor_forward(x, params, *, patch_size, layers_to_extract,
                              input_shape):
    b, c, h, w = x.shape
    if (c, h, w) != input_shape:
        raise ValueError(
            f"Input shape {(c, h, w)} does not match expected {input_shape}")

    gh, gw = h // patch_size, w // patch_size
    s = gh * gw

    # Patchify (pure layout glue, fused by XLA). Matches Conv2d(C, D, k=p, s=p):
    # each patch is flattened in (C, p, p) order.
    patches = x.reshape(b, c, gh, patch_size, gw, patch_size)
    patches = patches.transpose(0, 2, 4, 1, 3, 5)
    patches = patches.reshape(b * s, c * patch_size * patch_size)
    patches = patches.astype(jnp.bfloat16)

    # One fused Pallas kernel: patch-embed + all blocks, hook layers captured.
    feats = fused_backbone(patches, params,
                           layers_to_extract=layers_to_extract)  # (nh, B*S, D)
    d = feats.shape[-1]

    # Literal reshape semantics of the PyTorch module:
    #   grid_size = int((input_shape[1] // patch_size) ** 0.5)
    #   feat.view(B, g, g, -1).permute(0, 3, 1, 2)
    grid_size = int((input_shape[1] // patch_size) ** 0.5)
    assert grid_size > 0 and (s * d) % (grid_size * grid_size) == 0, (
        "feature map is not reshapeable with the module's grid_size formula")

    # TODO(synk): final view/permute kept in XLA (cheap layout glue at these
    # sizes); could be folded into the kernel's out_spec if it ever shows up
    # as HBM traffic.
    outs = []
    for k, _ in enumerate(sorted(layers_to_extract)):
        feat = feats[k].reshape(b, grid_size, grid_size, -1)  # view(B,g,g,-1)
        outs.append(feat.transpose(0, 3, 1, 2))               # permute(0,3,1,2)
    return outs


# ----------------------------------------------------------------------------
# Main
# ----------------------------------------------------------------------------
if __name__ == "__main__":
    B, C, H, W = 2, 4, 16, 16
    PATCH = 4
    EMBED = 128      # lane-dense (multiple of 128)
    HIDDEN = 256     # lane-dense (multiple of 128)
    NUM_BLOCKS = 4
    LAYERS = (1, 3)

    root = jax.random.PRNGKey(0)
    k_param, k_x = jax.random.split(root)

    params = init_params(k_param, C, PATCH, EMBED, HIDDEN, NUM_BLOCKS)
    x = jax.random.normal(k_x, (B, C, H, W), jnp.float32)

    feats = feature_extractor_forward(
        x, params,
        patch_size=PATCH,
        layers_to_extract=LAYERS,
        input_shape=(C, H, W),
    )

    # Expected shapes per the module's literal grid_size formula.
    g = int((H // PATCH) ** 0.5)                       # = 2
    S = (H // PATCH) * (W // PATCH)                    # = 16
    ch = (S * EMBED) // (g * g)                        # = 512
    assert len(feats) == len(LAYERS)
    for f in feats:
        jax.block_until_ready(f)
        assert f.shape == (B, ch, g, g), f.shape
        assert f.dtype == jnp.float32
        assert bool(jnp.all(jnp.isfinite(f)))

    print("KERNEL_OK")
</pallas_src>

<mosaic_0001>
module attributes {stable_mosaic.version = 11 : i64} {
  func.func @_fused_backbone_kernel(%arg0: i32, %arg1: i32, %arg2: memref<4xi32, #tpu.memory_space<smem>>, %arg3: memref<32x64xbf16, #tpu.memory_space<vmem>>, %arg4: memref<64x128xbf16, #tpu.memory_space<vmem>>, %arg5: memref<1x128xf32, #tpu.memory_space<vmem>>, %arg6: memref<1x1x128xf32, #tpu.memory_space<vmem>>, %arg7: memref<1x1x128xf32, #tpu.memory_space<vmem>>, %arg8: memref<1x128x256xbf16, #tpu.memory_space<vmem>>, %arg9: memref<1x1x256xf32, #tpu.memory_space<vmem>>, %arg10: memref<1x256x128xbf16, #tpu.memory_space<vmem>>, %arg11: memref<1x1x128xf32, #tpu.memory_space<vmem>>, %arg12: memref<2x32x128xf32, #tpu.memory_space<vmem>>, %arg13: memref<32x128xf32, #tpu.memory_space<vmem>>) attributes {dimension_semantics = [#tpu.dimension_semantics<parallel>, #tpu.dimension_semantics<arbitrary>], iteration_bounds = array<i64: 1, 4>, scalar_prefetch = 1 : i64, scratch_operands = 1 : i64, tpu.core_type = #tpu.core_type<tc>, window_params = [{transform_indices = @transform_0, window_bounds = array<i64: 32, 64>}, {pipeline_mode = #tpu.pipeline_mode<synchronous>, transform_indices = @transform_1, window_bounds = array<i64: 64, 128>}, {pipeline_mode = #tpu.pipeline_mode<synchronous>, transform_indices = @transform_2, window_bounds = array<i64: 1, 128>}, {transform_indices = @transform_3, window_bounds = array<i64: 1, 1, 128>}, {transform_indices = @transform_4, window_bounds = array<i64: 1, 1, 128>}, {transform_indices = @transform_5, window_bounds = array<i64: 1, 128, 256>}, {transform_indices = @transform_6, window_bounds = array<i64: 1, 1, 256>}, {transform_indices = @transform_7, window_bounds = array<i64: 1, 256, 128>}, {transform_indices = @transform_8, window_bounds = array<i64: 1, 1, 128>}, {transform_indices = @transform_9, window_bounds = array<i64: 2, 32, 128>}]} {
    %c0_i32 = arith.constant 0 : i32
    %0 = arith.cmpi eq, %arg1, %c0_i32 : i32
    %1 = arith.extui %0 : i1 to i32
    %c0_i32_0 = arith.constant 0 : i32
    %2 = arith.cmpi ne, %1, %c0_i32_0 : i32
    scf.if %2 {
      %c0_35 = arith.constant 0 : index
      %c0_36 = arith.constant 0 : index
      %68 = vector.load %arg3[%c0_35, %c0_36] : memref<32x64xbf16, #tpu.memory_space<vmem>>, vector<32x64xbf16>
      %c0_37 = arith.constant 0 : index
      %c0_38 = arith.constant 0 : index
      %69 = vector.load %arg4[%c0_37, %c0_38] : memref<64x128xbf16, #tpu.memory_space<vmem>>, vector<64x128xbf16>
      %cst_39 = arith.constant dense<0.000000e+00> : vector<32x128xf32>
      %70 = tpu.matmul %68, %69, %cst_39 {dimension_numbers = #tpu.dot_dimension_numbers<[1], [0], [0], [1], [0, 0, 1, 1], [], []>} : vector<32x64xbf16>, vector<64x128xbf16>, vector<32x128xf32> -> vector<32x128xf32>
      %c0_40 = arith.constant 0 : index
      %c0_41 = arith.constant 0 : index
      %71 = vector.load %arg5[%c0_40, %c0_41] : memref<1x128xf32, #tpu.memory_space<vmem>>, vector<1x128xf32>
      %72 = vector.broadcast %71 : vector<1x128xf32> to vector<32x128xf32>
      %73 = arith.addf %70, %72 : vector<32x128xf32>
      %c0_42 = arith.constant 0 : index
      %c0_43 = arith.constant 0 : index
      %74 = vector.load %arg13[%c0_42, %c0_43] : memref<32x128xf32, #tpu.memory_space<vmem>>, vector<32x128xf32>
      tpu.vector_store %arg13[%c0_42, %c0_43], %73 {strides = array<i32>} : memref<32x128xf32, #tpu.memory_space<vmem>>, vector<32x128xf32>,
    } else {
    }
    %c0 = arith.constant 0 : index
    %c0_1 = arith.constant 0 : index
    %3 = vector.load %arg13[%c0, %c0_1] : memref<32x128xf32, #tpu.memory_space<vmem>>, vector<32x128xf32>
    %cst = arith.constant dense<0.000000e+00> : vector<32xf32>
    %4 = vector.multi_reduction <add>, %3, %cst [1] : vector<32x128xf32> to vector<32xf32>
    %5 = vector.shape_cast %4 : vector<32xf32> to vector<32x1xf32>
    %cst_2 = arith.constant 1.280000e+02 : f32
    %6 = vector.broadcast %cst_2 : f32 to vector<32x1xf32>
    %7 = arith.divf %5, %6 : vector<32x1xf32>
    %8 = arith.mulf %3, %3 : vector<32x128xf32>
    %cst_3 = arith.constant dense<0.000000e+00> : vector<32xf32>
    %9 = vector.multi_reduction <add>, %8, %cst_3 [1] : vector<32x128xf32> to vector<32xf32>
    %10 = vector.shape_cast %9 : vector<32xf32> to vector<32x1xf32>
    %cst_4 = arith.constant 1.280000e+02 : f32
    %11 = vector.broadcast %cst_4 : f32 to vector<32x1xf32>
    %12 = arith.divf %10, %11 : vector<32x1xf32>
    %13 = arith.mulf %7, %7 : vector<32x1xf32>
    %14 = arith.subf %12, %13 : vector<32x1xf32>
    %cst_5 = arith.constant 0.000000e+00 : f32
    %15 = vector.broadcast %cst_5 : f32 to vector<32x1xf32>
    %16 = arith.maximumf %14, %15 : vector<32x1xf32>
    %17 = vector.broadcast %7 : vector<32x1xf32> to vector<32x128xf32>
    %18 = arith.subf %3, %17 : vector<32x128xf32>
    %cst_6 = arith.constant 9.99999974E-6 : f32
    %19 = vector.broadcast %cst_6 : f32 to vector<32x1xf32>
    %20 = arith.addf %16, %19 : vector<32x1xf32>
    %21 = math.rsqrt %20 : vector<32x1xf32>
    %22 = vector.broadcast %21 : vector<32x1xf32> to vector<32x128xf32>
    %23 = arith.mulf %18, %22 : vector<32x128xf32>
    %c0_7 = arith.constant 0 : index
    %c0_8 = arith.constant 0 : index
    %c0_9 = arith.constant 0 : index
    %24 = vector.load %arg6[%c0_7, %c0_8, %c0_9] : memref<1x1x128xf32, #tpu.memory_space<vmem>>, vector<1x1x128xf32>
    %25 = vector.shape_cast %24 : vector<1x1x128xf32> to vector<1x128xf32>
    %26 = vector.broadcast %25 : vector<1x128xf32> to vector<32x128xf32>
    %27 = arith.mulf %23, %26 : vector<32x128xf32>
    %c0_10 = arith.constant 0 : index
    %c0_11 = arith.constant 0 : index
    %c0_12 = arith.constant 0 : index
    %28 = vector.load %arg7[%c0_10, %c0_11, %c0_12] : memref<1x1x128xf32, #tpu.memory_space<vmem>>, vector<1x1x128xf32>
    %29 = vector.shape_cast %28 : vector<1x1x128xf32> to vector<1x128xf32>
    %30 = vector.broadcast %29 : vector<1x128xf32> to vector<32x128xf32>
    %31 = arith.addf %27, %30 : vector<32x128xf32>
    %32 = arith.truncf %31 : vector<32x128xf32> to vector<32x128xbf16>
    %c0_13 = arith.constant 0 : index
    %c0_14 = arith.constant 0 : index
    %c0_15 = arith.constant 0 : index
    %33 = vector.load %arg8[%c0_13, %c0_14, %c0_15] : memref<1x128x256xbf16, #tpu.memory_space<vmem>>, vector<1x128x256xbf16>
    %34 = vector.shape_cast %33 : vector<1x128x256xbf16> to vector<128x256xbf16>
    %cst_16 = arith.constant dense<0.000000e+00> : vector<32x256xf32>
    %35 = tpu.matmul %32, %34, %cst_16 {dimension_numbers = #tpu.dot_dimension_numbers<[1], [0], [0], [1], [0, 0, 1, 1], [], []>} : vector<32x128xbf16>, vector<128x256xbf16>, vector<32x256xf32> -> vector<32x256xf32>
    %c0_17 = arith.constant 0 : index
    %c0_18 = arith.constant 0 : index
    %c0_19 = arith.constant 0 : index
    %36 = vector.load %arg9[%c0_17, %c0_18, %c0_19] : memref<1x1x256xf32, #tpu.memory_space<vmem>>, vector<1x1x256xf32>
    %37 = vector.shape_cast %36 : vector<1x1x256xf32> to vector<1x256xf32>
    %38 = vector.broadcast %37 : vector<1x256xf32> to vector<32x256xf32>
    %39 = arith.addf %35, %38 : vector<32x256xf32>
    %40 = arith.mulf %39, %39 : vector<32x256xf32>
    %41 = arith.mulf %39, %40 : vector<32x256xf32>
    %cst_20 = arith.constant 4.471500e-02 : f32
    %42 = vector.broadcast %cst_20 : f32 to vector<32x256xf32>
    %43 = arith.mulf %42, %41 : vector<32x256xf32>
    %44 = arith.addf %39, %43 : vector<32x256xf32>
    %cst_21 = arith.constant 0.797884583 : f32
    %45 = vector.broadcast %cst_21 : f32 to vector<32x256xf32>
    %46 = arith.mulf %45, %44 : vector<32x256xf32>
    %47 = math.tanh %46 : vector<32x256xf32>
    %cst_22 = arith.constant 1.000000e+00 : f32
    %48 = vector.broadcast %cst_22 : f32 to vector<32x256xf32>
    %49 = arith.addf %48, %47 : vector<32x256xf32>
    %cst_23 = arith.constant 5.000000e-01 : f32
    %50 = vector.broadcast %cst_23 : f32 to vector<32x256xf32>
    %51 = arith.mulf %50, %49 : vector<32x256xf32>
    %52 = arith.mulf %39, %51 : vector<32x256xf32>
    %53 = arith.truncf %52 : vector<32x256xf32> to vector<32x256xbf16>
    %c0_24 = arith.constant 0 : index
    %c0_25 = arith.constant 0 : index
    %c0_26 = arith.constant 0 : index
    %54 = vector.load %arg10[%c0_24, %c0_25, %c0_26] : memref<1x256x128xbf16, #tpu.memory_space<vmem>>, vector<1x256x128xbf16>
    %55 = vector.shape_cast %54 : vector<1x256x128xbf16> to vector<256x128xbf16>
    %cst_27 = arith.constant dense<0.000000e+00> : vector<32x128xf32>
    %56 = tpu.matmul %53, %55, %cst_27 {dimension_numbers = #tpu.dot_dimension_numbers<[1], [0], [0], [1], [0, 0, 1, 1], [], []>} : vector<32x256xbf16>, vector<256x128xbf16>, vector<32x128xf32> -> vector<32x128xf32>
    %c0_28 = arith.constant 0 : index
    %c0_29 = arith.constant 0 : index
    %c0_30 = arith.constant 0 : index
    %57 = vector.load %arg11[%c0_28, %c0_29, %c0_30] : memref<1x1x128xf32, #tpu.memory_space<vmem>>, vector<1x1x128xf32>
    %58 = vector.shape_cast %57 : vector<1x1x128xf32> to vector<1x128xf32>
    %59 = vector.broadcast %58 : vector<1x128xf32> to vector<32x128xf32>
    %60 = arith.addf %56, %59 : vector<32x128xf32>
    %61 = arith.addf %3, %60 : vector<32x128xf32>
    %c0_31 = arith.constant 0 : index
    %c0_32 = arith.constant 0 : index
    %62 = vector.load %arg13[%c0_31, %c0_32] : memref<32x128xf32, #tpu.memory_space<vmem>>, vector<32x128xf32>
    tpu.vector_store %arg13[%c0_31, %c0_32], %61 {strides = array<i32>} : memref<32x128xf32, #tpu.memory_space<vmem>>, vector<32x128xf32>,
    %63 = arith.index_cast %arg1 : i32 to index
    %64 = memref.load %arg2[%63] : memref<4xi32, #tpu.memory_space<smem>>
    %c0_i32_33 = arith.constant 0 : i32
    %65 = arith.cmpi sge, %64, %c0_i32_33 : i32
    %66 = arith.extui %65 : i1 to i32
    %c0_i32_34 = arith.constant 0 : i32
    %67 = arith.cmpi ne, %66, %c0_i32_34 : i32
    scf.if %67 {
      %68 = arith.index_cast %64 : i32 to index
      %c0_35 = arith.constant 0 : index
      %c0_36 = arith.constant 0 : index
      %69 = vector.load %arg12[%68, %c0_35, %c0_36] : memref<2x32x128xf32, #tpu.memory_space<vmem>>, vector<1x32x128xf32>
      %70 = vector.shape_cast %69 : vector<1x32x128xf32> to vector<32x128xf32>
      %71 = vector.shape_cast %61 : vector<32x128xf32> to vector<1x32x128xf32>
      tpu.vector_store %arg12[%68, %c0_35, %c0_36], %71 {strides = array<i32>} : memref<2x32x128xf32, #tpu.memory_space<vmem>>, vector<1x32x128xf32>,
    } else {
    }
    return
  }
  func.func @transform_0(%arg0: i32, %arg1: i32, %arg2: memref<4xi32, #tpu.memory_space<smem>>) -> (i32, i32) {
    %c0_i32 = arith.constant 0 : i32
    %c0_i32_0 = arith.constant 0 : i32
    return %arg0, %c0_i32 : i32, i32
  }
  func.func @transform_1(%arg0: i32, %arg1: i32, %arg2: memref<4xi32, #tpu.memory_space<smem>>) -> (i32, i32) {
    %c0_i32 = arith.constant 0 : i32
    %c0_i32_0 = arith.constant 0 : i32
    %c0_i32_1 = arith.constant 0 : i32
    return %c0_i32, %c0_i32_0 : i32, i32
  }
  func.func @transform_2(%arg0: i32, %arg1: i32, %arg2: memref<4xi32, #tpu.memory_space<smem>>) -> (i32, i32) {
    %c0_i32 = arith.constant 0 : i32
    %c0_i32_0 = arith.constant 0 : i32
    %c0_i32_1 = arith.constant 0 : i32
    return %c0_i32, %c0_i32_0 : i32, i32
  }
  func.func @transform_3(%arg0: i32, %arg1: i32, %arg2: memref<4xi32, #tpu.memory_space<smem>>) -> (i32, i32, i32) {
    %c0_i32 = arith.constant 0 : i32
    %c0_i32_0 = arith.constant 0 : i32
    %c0_i32_1 = arith.constant 0 : i32
    return %arg1, %c0_i32, %c0_i32_0 : i32, i32, i32
  }
  func.func @transform_4(%arg0: i32, %arg1: i32, %arg2: memref<4xi32, #tpu.memory_space<smem>>) -> (i32, i32, i32) {
    %c0_i32 = arith.constant 0 : i32
    %c0_i32_0 = arith.constant 0 : i32
    %c0_i32_1 = arith.constant 0 : i32
    return %arg1, %c0_i32, %c0_i32_0 : i32, i32, i32
  }
  func.func @transform_5(%arg0: i32, %arg1: i32, %arg2: memref<4xi32, #tpu.memory_space<smem>>) -> (i32, i32, i32) {
    %c0_i32 = arith.constant 0 : i32
    %c0_i32_0 = arith.constant 0 : i32
    %c0_i32_1 = arith.constant 0 : i32
    return %arg1, %c0_i32, %c0_i32_0 : i32, i32, i32
  }
  func.func @transform_6(%arg0: i32, %arg1: i32, %arg2: memref<4xi32, #tpu.memory_space<smem>>) -> (i32, i32, i32) {
    %c0_i32 = arith.constant 0 : i32
    %c0_i32_0 = arith.constant 0 : i32
    %c0_i32_1 = arith.constant 0 : i32
    return %arg1, %c0_i32, %c0_i32_0 : i32, i32, i32
  }
  func.func @transform_7(%arg0: i32, %arg1: i32, %arg2: memref<4xi32, #tpu.memory_space<smem>>) -> (i32, i32, i32) {
    %c0_i32 = arith.constant 0 : i32
    %c0_i32_0 = arith.constant 0 : i32
    %c0_i32_1 = arith.constant 0 : i32
    return %arg1, %c0_i32, %c0_i32_0 : i32, i32, i32
  }
  func.func @transform_8(%arg0: i32, %arg1: i32, %arg2: memref<4xi32, #tpu.memory_space<smem>>) -> (i32, i32, i32) {
    %c0_i32 = arith.constant 0 : i32
    %c0_i32_0 = arith.constant 0 : i32
    %c0_i32_1 = arith.constant 0 : i32
    return %arg1, %c0_i32, %c0_i32_0 : i32, i32, i32
  }
  func.func @transform_9(%arg0: i32, %arg1: i32, %arg2: memref<4xi32, #tpu.memory_space<smem>>) -> (i32, i32, i32) {
    %c0_i32 = arith.constant 0 : i32
    %c0_i32_0 = arith.constant 0 : i32
    %c0_i32_1 = arith.constant 0 : i32
    return %c0_i32, %arg0, %c0_i32_0 : i32, i32, i32
  }
}

</mosaic_0001>

<bundles_post_ra>
// kernel: squeeze.3
= control target key start
LH: loop header
LB: loop body
LE: loop exit
PB: predicated region body
PF: predicated region fallthrough
CT: control target
= control target key end

     0   :  { %2 = vsyncpa [#allocation1], 0  ;;  %s207_s0 = inlined_call_operand.vmem [shape: f32[1,32,128], index: 0, kind: input, shape index: {}]   ;;  %s208_s1 = inlined_call_operand.hbm [shape: f32[2,2,2,512], index: 1, kind: output, shape index: {}]  }
   0x1   :  { %v3_v0 = vld [vmem:[%s207_s0] sm:$0xff]   ;;  %v144_v1 = vld [vmem:[%s207_s0 + $0x8] sm:$0xff]   ;;  %v145_v2 = vld [vmem:[%s207_s0 + $0x10] sm:$0xff]  }
   0x2   :  { %4 = vst [vmem:[#allocation2] ss:$8 sm:$0xf] %v3_v0   ;;  %6 = vst [vmem:[#allocation2 - $0x1f] ss:$8 sm:$0xf0] %v3_v0  }
   0x3   :  { %10 = vst [vmem:[#allocation2 + $0x20] ss:$8 sm:$0xf] %v144_v1   ;;  %12 = vst [vmem:[#allocation2 + $0x1] ss:$8 sm:$0xf0] %v144_v1  }
   0x4   :  { %v146_v3 = vld [vmem:[%s207_s0 + $0x18] sm:$0xff]   ;;  %16 = vst [vmem:[#allocation2 + $0x40] ss:$8 sm:$0xf] %v145_v2   ;;  %s172_s0 = smov [#allocation0]  }
   0x5   :  { %18 = vst [vmem:[#allocation2 + $0x21] ss:$8 sm:$0xf0] %v145_v2   ;;  %22 = vst [vmem:[#allocation2 + $0x60] ss:$8 sm:$0xf] %v146_v3  }
   0x6   :  { %24 = vst [vmem:[#allocation2 + $0x41] ss:$8 sm:$0xf0] %v146_v3   ;;  %s124_s14 = sshll.u32 %s172_s0, 4  ;;  %s125_s14 = int_to_ptr.vmem [resolvable:$true] %s124_s14 }
   0x7   :  { %s148_s15 = scalar_lea.vmem %s125_s14, 512  ;;  %p153_p1 = scmp.lt.s32.totalorder %s125_s14, %s125_s14 }
   0x8   :  { %p149_p0 = scmp.ne.s32.totalorder %s125_s14, %s148_s15  ;;  %p154_p2 = scmp.lt.s32.totalorder %s148_s15, %s148_s15 }
   0x9   :  { %v28_v4 = vld [vmem:[#allocation2] sm:$0x3]  ;;  %v32_v5 = vld [vmem:[#allocation2 + $0x8] sm:$0x3]  ;;  %v37_v6 = vld [vmem:[#allocation2 + $0x10] sm:$0x3] }
   0xa   :  { %30 = vst [vmem:[#allocation0] sm:$0x3] %v28_v4  ;;  %35 = vst [vmem:[#allocation0 + $0x2] sm:$0x3] %v32_v5  ;;  %v43_v7 = vld [vmem:[#allocation2 + $0x18] sm:$0x3]  ;;  %p155_p3 = por %p154_p2, %p153_p1 }
   0xb   :  { %41 = vst [vmem:[#allocation0 + $0x4] sm:$0x3] %v37_v6  ;;  %v49_v8 = vld [vmem:[#allocation2 + $0x20] sm:$0x3]  ;;  %v55_v9 = vld [vmem:[#allocation2 + $0x28] sm:$0x3] }
   0xc   :  { %47 = vst [vmem:[#allocation0 + $0x6] sm:$0x3] %v43_v7  ;;  %53 = vst [vmem:[#allocation0 + $0x8] sm:$0x3] %v49_v8  ;;  %v61_v10 = vld [vmem:[#allocation2 + $0x30] sm:$0x3]  ;;  %p156_p4 = pnand %p155_p3, %p149_p0 }
   0xd   :  { %59 = vst [vmem:[#allocation0 + $0xa] sm:$0x3] %v55_v9  ;;  %v67_v11 = vld [vmem:[#allocation2 + $0x38] sm:$0x3]  ;;  %v73_v12 = vld [vmem:[#allocation2 + $0x40] sm:$0x3] }
   0xe   :  { %65 = vst [vmem:[#allocation0 + $0xc] sm:$0x3] %v61_v10  ;;  %71 = vst [vmem:[#allocation0 + $0xe] sm:$0x3] %v67_v11  ;;  %v79_v13 = vld [vmem:[#allocation2 + $0x48] sm:$0x3] }
   0xf   :  { %77 = vst [vmem:[#allocation0 + $0x10] sm:$0x3] %v73_v12  ;;  %v85_v14 = vld [vmem:[#allocation2 + $0x50] sm:$0x3]  ;;  %v91_v15 = vld [vmem:[#allocation2 + $0x58] sm:$0x3] }
  0x10   :  { %83 = vst [vmem:[#allocation0 + $0x12] sm:$0x3] %v79_v13  ;;  %89 = vst [vmem:[#allocation0 + $0x14] sm:$0x3] %v85_v14  ;;  %v97_v16 = vld [vmem:[#allocation2 + $0x60] sm:$0x3] }
  0x11   :  { %95 = vst [vmem:[#allocation0 + $0x16] sm:$0x3] %v91_v15  ;;  %v103_v17 = vld [vmem:[#allocation2 + $0x68] sm:$0x3]  ;;  %v109_v18 = vld [vmem:[#allocation2 + $0x70] sm:$0x3] }
  0x12   :  { %101 = vst [vmem:[#allocation0 + $0x18] sm:$0x3] %v97_v16  ;;  %107 = vst [vmem:[#allocation0 + $0x1a] sm:$0x3] %v103_v17  ;;  %v115_v19 = vld [vmem:[#allocation2 + $0x78] sm:$0x3] }
  0x13   :  { %113 = vst [vmem:[#allocation0 + $0x1c] sm:$0x3] %v109_v18  ;;  %119 = vst [vmem:[#allocation0 + $0x1e] sm:$0x3] %v115_v19 }
  0x14   :  { %159 = shalt.err (!%p156_p4)
}
  0x15   :  { %s160_s18 = scalar_lea.hbm %s208_s1, 512 }
  0x16   :  { %p161_p5 = scmp.ne.s32.totalorder %s208_s1, %s160_s18  ;;  %p164_p6 = scmp.lt.u32.totalorder %s160_s18, %s208_s1 }
  0x18   :  { %p166_p7 = pnand %p164_p6, %p161_p5 }
  0x1a   :  { %169 = shalt.err (!%p166_p7)
}
  0x1b   :  { %127 = dma.vmem_to_hbm [thread:$0]  %s125_s14, 512, %s208_s1, [#allocation1]  }
  0x1c   :  { %170 = dma.done.wait [#allocation1], 512  }
  0x1d   :  { %171 = vsyncadd [#allocation1], 4294966784 }
  0x1e   :  { %129 = vsyncpa [#allocation1], 1 }

// kernel: feature_extractor_forward.1
= control target key start
LH: loop header
LB: loop body
LE: loop exit
PB: predicated region body
PF: predicated region fallthrough
CT: control target
= control target key end

     0   :  { %s1756_s0 = inlined_call_operand.vmem [shape: s32[4], index: 0, kind: input, shape index: {}]   ;;  %s1757_s1 = inlined_call_operand.vmem [shape: bf16[32,64], index: 1, kind: input, shape index: {}]   ;;  %s1758_s2 = inlined_call_operand.vmem [shape: bf16[64,128], index: 2, kind: input, shape index: {}]   ;;  %s1759_s3 = inlined_call_operand.vmem [shape: f32[1,128], index: 3, kind: input, shape index: {}]   ;;  %s1760_s4 = inlined_call_operand.vmem [shape: f32[4,1,128], index: 4, kind: input, shape index: {}]   ;;  %s1761_s5 = inlined_call_operand.vmem [shape: f32[4,1,128], index: 5, kind: input, shape index: {}]   ;;  %s1762_s6 = inlined_call_operand.vmem [shape: bf16[4,128,256], index: 6, kind: input, shape index: {}]   ;;  %s1763_s7 = inlined_call_operand.vmem [shape: f32[4,1,256], index: 7, kind: input, shape index: {}]   ;;  %s1764_s8 = inlined_call_operand.vmem [shape: bf16[4,256,128], index: 8, kind: input, shape index: {}]   ;;  %s1765_s9 = inlined_call_operand.vmem [shape: f32[4,1,128], index: 9, kind: input, shape index: {}]   ;;  %s1766_s10 = inlined_call_operand.vmem [shape: f32[2,32,128], index: 10, kind: output, shape index: {}]  }
   0x1   :  { %s15_s15 = sshll.u32 %s1756_s0, 4  ;;  %s16_s15 = int_to_ptr.vmem [resolvable:$true] %s15_s15 }
   0x2   :  { %s1432_s16 = scalar_lea.vmem %s16_s15, 16  ;;  %p1437_p1 = scmp.lt.s32.totalorder %s16_s15, %s16_s15 }
   0x3   :  { %p1433_p0 = scmp.ne.s32.totalorder %s16_s15, %s1432_s16  ;;  %p1438_p2 = scmp.lt.s32.totalorder %s1432_s16, %s1432_s16 }
   0x5   :  { %p1439_p3 = por %p1438_p2, %p1437_p1 }
   0x7   :  { %p1440_p4 = pnand %p1439_p3, %p1433_p0 }
   0x9   :  { %1443 = shalt.err (!%p1440_p4)  }
   0xa   :  { %s1470_s17 = smov [#allocation4]  }
   0xb   :  { %18 = dma.vmem_to_smem %s16_s15, 16, %s1470_s17, [#allocation3] }
   0xc   :  { %1456 = dma.done.wait [#allocation3], 16 }
   0xd   :  { %1457 = vsyncadd [#allocation3], 4294967280 }
   0xe   :  { %20 = sfence }
   0xf   :  { %s1530_s18 = smov 0   ;;  %s1532_s19 = smov 0  }
  0x10   :  { %s1534_s20 = smov 0  }
  0x11 LB: > { %s35_s0 = sadd.s32 1, %s1464_s19  ;;  %p1231_p5 = scmp.ge.s32.totalorder %s1468_s20, 1  ;;  %s1468_s20 = sphi %s1534_s20, %s26_s20   ;;  %s1464_s19 = sphi %s1532_s19, %s1769_s19   ;;  %s1460_s18 = sphi %s1530_s18, %s1768_s18  }
  0x12   : > { %p36_p6 = scmp.ge.s32.totalorder %s35_s0, 4  ;;  %p360_p7 = scmp.lt.s32.totalorder %s1468_s20, 5 }
  0x14   : > { %s1771_s0 = smov (%p36_p6, %s35_s0), 0  ;;  %p361_p8 = pnand %p1231_p5, %p360_p7 }
  0x15   : > { %p425_p9 = scmp.lt.s32.totalorder (!%p361_p8), %s1460_s18, 3  ;;  %p1237_p10 = scmp.ne.s32.totalorder (!%p361_p8), %s1460_s18, 0 }
  0x16   : > { %364 = sbr.rel (%p361_p8) target bundleno = 922 (0x39a), region = 56 }
  0x1d   : > { %s1552_s21 = scalar_select %p425_p9, %s1460_s18, 3 }
  0x1e   : > { %458 = sbr.rel (%p1237_p10) target bundleno = 265 (0x109), region = 60  ;;  %v1362_v0 = vld [vmem:[%s1758_s2] sm:$0xff] (!%p1237_p10)   ;;  %v1363_v1 = vld [vmem:[%s1758_s2 + $0x8] sm:$0xff] (!%p1237_p10)   ;;  %v1364_v2 = vld [vmem:[%s1758_s2 + $0x10] sm:$0xff] (!%p1237_p10)   ;;  %vm512_vm0 = vcmask (!%p1237_p10), 523264  }
  0x1f   : > { %s427_s24 = scalar_lea.vmem %s1760_s4, %s1552_s21  ;;  %s1288_s28 = sshll.u32 %s1552_s21, 7  ;;  %1324 = vmatprep.subr.bf16.mxu0 (!%p1237_p10), %v1362_v0  ;;  %v1366_v3 = vld [vmem:[%s1757_s1] sm:$0xff] (!%p1237_p10)   ;;  %v1365_v4 = vld [vmem:[%s1758_s2 + $0x18] sm:$0xff] (!%p1237_p10)   ;;  %v1367_v5 = vld [vmem:[%s1757_s1 + $0x8] sm:$0xff] (!%p1237_p10)  }
  0x20   : > { %s1234_s29 = sshll.u32 %s1552_s21, 1  ;;  %s1567_s12 = scalar_lea.vmem %s1762_s6, %s1288_s28  ;;  %1325 = vmatpush3.bf16.msra.mxu0 (!%p1237_p10), %v1362_v0  ;;  %1332 = vmatprep.mubr.msk.bf16.mxu0 (!%p1237_p10), %vm512_vm0, %v1366_v3  ;;  %v1238_v6 = vld [vmem:[%s1759_s3] ss:$0 sm:$0xff] (!%p1237_p10) }
  0x21   : > { %s1572_s15 = scalar_lea.vmem %s1763_s7, %s1234_s29  ;;  %s1577_s22 = scalar_lea.vmem %s1764_s8, %s1288_s28  ;;  %1326 = vmatprep.subr.bf16.mxu0 (!%p1237_p10), %v1363_v1 }
  0x22   : > { %s447_s26 = scalar_lea.vmem %s1765_s9, %s1552_s21 }
  0x24   : > { %1327 = vmatpush3.bf16.msra.mxu0 (!%p1237_p10), %v1363_v1 }
  0x25   : > { %1328 = vmatprep.subr.bf16.mxu0 %v1364_v2 }
  0x28   : > { %1329 = vmatpush3.bf16.msra.mxu0 %v1364_v2 }
  0x29   : > { %1330 = vmatprep.subr.bf16.mxu0 %v1365_v4 }
  0x2c   : > { %1331 = vmatpush3.bf16.msra.mxu0 %v1365_v4 }
  0x2f   : > { %1333 = vmatmul.mubr.msk.bf16.vlgmr.msra.gmra.mrb[0].mxu0 %vm512_vm0, %v1367_v5 }
 0x102   : > { %v1334_v7 = vpop.f32.mrb[0].mxu0 }
 0x103   : > { %v562_v8 = vadd.f32 %v1334_v7, %v1238_v6  ;;  %v553_v9 = vpop.f32.mrb[1].mxu0 }
 0x104   : > { %v554_v10 = vadd.f32 %v1238_v6, %v553_v9  ;;  %v1335_v11 = vpop.f32.mrb[2].mxu0 }
 0x105   : > { %570 = vst [vmem:[#allocation2 + $0x10] sm:$0xff] %v562_v8  ;;  %v565_v12 = vadd.f32 %v1335_v11, %v1238_v6  ;;  %v556_v13 = vpop.f32.mrb[3].mxu0 }
 0x106   : > { %568 = vst [vmem:[#allocation2] sm:$0xff] %v554_v10  ;;  %v557_v14 = vadd.f32 %v1238_v6, %v556_v13 }
 0x107   : > { %571 = vst [vmem:[#allocation2 + $0x18] sm:$0xff] %v565_v12 }
 0x108   : > { %569 = vst [vmem:[#allocation2 + $0x8] sm:$0xff] %v557_v14 }
 0x109 PF: > { %v1368_v23 = vld [vmem:[%s1567_s12 + $0x4] ss:$8 sps:$4 sm:$0xff]   ;;  %v1370_v24 = vld [vmem:[%s1567_s12] ss:$8 sps:$4 sm:$0xff]   ;;  %v1371_v25 = vld [vmem:[%s1567_s12 + $0x14] ss:$8 sps:$4 sm:$0xff]   ;;  %s1767_s14 = scalar_lea.vmem %s1761_s5, %s1552_s21 }
 0x10a   : > { %765 = vmatprep.subr.bf16.mxu0 %v1368_v23  ;;  %v1373_v26 = vld [vmem:[%s1567_s12 + $0x10] ss:$8 sps:$4 sm:$0xff]   ;;  %v1374_v27 = vld [vmem:[%s1567_s12 + $0x24] ss:$8 sps:$4 sm:$0xff]   ;;  %v1376_v28 = vld [vmem:[%s1567_s12 + $0x20] ss:$8 sps:$4 sm:$0xff]  }
 0x10b   : > { %766 = vmatpush1.bf16.msra.mxu0 %v1370_v24  ;;  %v1377_v29 = vld [vmem:[%s1567_s12 + $0x34] ss:$8 sps:$4 sm:$0xff]   ;;  %v1379_v30 = vld [vmem:[%s1567_s12 + $0x30] ss:$8 sps:$4 sm:$0xff]   ;;  %v1380_v31 = vld [vmem:[%s1567_s12 + $0x44] ss:$8 sps:$4 sm:$0xff]  }
 0x10c   : > { %v1614_v19 = vld [vmem:[#allocation2 + $0x10] sm:$0xff]  ;;  %767 = vmatprep.subr.bf16.mxu0 %v1371_v25  ;;  %v1382_v32 = vld [vmem:[%s1567_s12 + $0x40] ss:$8 sps:$4 sm:$0xff]   ;;  %v1386_v35 = vld [vmem:[%s1567_s12 + $0x64] ss:$8 sps:$4 sm:$0xff]   ;;  %v1471_v38 = vmov 0  }
 0x10d   : > { %v1605_v15 = vld [vmem:[#allocation2] sm:$0xff]  ;;  %v591_v21 = vmul.f32 %v1614_v19, %v1614_v19  ;;  %v1383_v33 = vld [vmem:[%s1567_s12 + $0x54] ss:$8 sps:$4 sm:$0xff]   ;;  %v1385_v34 = vld [vmem:[%s1567_s12 + $0x50] ss:$8 sps:$4 sm:$0xff]   ;;  %797 = vmatprep.mubr.bf16.mxu0 %v1471_v38 }
 0x10e   : > { %576 = vadd.xlane.f32.xlu0 %v1605_v15  ;;  %v589_v17 = vmul.f32 %v1605_v15, %v1605_v15  ;;  %v1617_v20 = vld [vmem:[#allocation2 + $0x18] sm:$0xff]  ;;  %v1388_v36 = vld [vmem:[%s1567_s12 + $0x60] ss:$8 sps:$4 sm:$0xff]  }
 0x10f   : > { %v1607_v16 = vld [vmem:[#allocation2 + $0x8] sm:$0xff]  ;;  %v592_v22 = vmul.f32 %v1617_v20, %v1617_v20  ;;  %768 = vmatpush1.bf16.msra.mxu0 %v1373_v26  ;;  %v1389_v37 = vld [vmem:[%s1567_s12 + $0x74] ss:$8 sps:$4 sm:$0xff]   ;;  %v1391_v39 = vld [vmem:[%s1567_s12 + $0x70] ss:$8 sps:$4 sm:$0xff]  }
 0x110   : > { %593 = vadd.xlane.f32.xlu1 %v589_v17  ;;  %v590_v18 = vmul.f32 %v1607_v16, %v1607_v16  ;;  %769 = vmatprep.subr.bf16.mxu0 %v1374_v27  ;;  %v1247_v11 = vld [vmem:[%s427_s24] ss:$0 sm:$0xff]  ;;  %s1731_s24 = sld [smem:[#allocation4 + %s1460_s18]] }
 0x112   : > { %578 = vadd.xlane.f32.xlu0 %v1607_v16 }
 0x113   : > { %770 = vmatpush1.bf16.msra.mxu0 %v1376_v28 }
 0x114   : > { %595 = vadd.xlane.f32.xlu1 %v590_v18  ;;  %771 = vmatprep.subr.bf16.mxu0 %v1377_v29  ;;  %v1248_v18 = vld [vmem:[%s1767_s14] ss:$0 sm:$0xff] }
 0x116   : > { %580 = vadd.xlane.f32.xlu0 %v1614_v19  ;;  %p1282_p11 = scmp.lt.s32.totalorder %s1731_s24, 0 }
 0x117   : > { %772 = vmatpush1.bf16.msra.mxu0 %v1379_v30  ;;  %s1283_s18 = sshll.u32 (!%p1282_p11), %s1731_s24, 5 }
 0x118   : > { %582 = vadd.xlane.f32.xlu1 %v1617_v20  ;;  %773 = vmatprep.subr.bf16.mxu0 %v1380_v31  ;;  %s1092_s16 = scalar_lea.vmem (!%p1282_p11), %s1766_s10, %s1283_s18 }
 0x11a   : > { %597 = vadd.xlane.f32.xlu0 %v591_v21 }
 0x11b   : > { %774 = vmatpush1.bf16.msra.mxu0 %v1382_v32 }
 0x11c   : > { %599 = vadd.xlane.f32.xlu1 %v592_v22  ;;  %775 = vmatprep.subr.bf16.mxu0 %v1383_v33 }
 0x11f   : > { %776 = vmatpush1.bf16.msra.mxu0 %v1385_v34 }
 0x120   : > { %777 = vmatprep.subr.bf16.mxu0 %v1386_v35 }
 0x123   : > { %778 = vmatpush1.bf16.msra.mxu0 %v1388_v36  ;;  %v1392_v36 = vld [vmem:[%s1577_s22 + $0x40] sm:$0xff]  }
 0x124   : > { %779 = vmatprep.subr.bf16.mxu0 %v1389_v37  ;;  %v1393_v37 = vld [vmem:[%s1577_s22] sm:$0xff]   ;;  %1296 = vmatprep.subr.bf16.mxu1 %v1392_v36 }
 0x125   : > { %1297 = vmatpush3.bf16.msra.mxu1 %v1393_v37 }
 0x127   : > { %780 = vmatpush1.bf16.msra.mxu0 %v1391_v39  ;;  %v1394_v39 = vld [vmem:[%s1577_s22 + $0x48] sm:$0xff]  }
 0x128   : > { %1298 = vmatprep.subr.bf16.mxu1 %v1394_v39 }
 0x19b   : > { %v577_v40 = vpop.xlane.xlu0 %576 }
 0x19c   : > { %v585_v41 = vmul.f32 0.0078125, %v577_v40  ;;  %v1395_v40 = vld [vmem:[%s1577_s22 + $0x8] sm:$0xff]  }
 0x19d   : > { %v594_v42 = vpop.xlane.xlu1 %593  ;;  %1299 = vmatpush3.bf16.msra.mxu1 %v1395_v40 }
 0x19e   : > { %v605_v43 = vmul.f32 %v585_v41, %v585_v41  ;;  %v601_v44 = vmul.f32 0.0078125, %v594_v42  ;;  %v617_v7 = vsub.f32 %v1605_v15, %v585_v41  ;;  %v1397_v41 = vld [vmem:[%s1577_s22 + $0x10] sm:$0xff]   ;;  %v1398_v42 = vld [vmem:[%s1577_s22 + $0x58] sm:$0xff]  }
 0x19f   : > { %v579_v45 = vpop.xlane.xlu0 %578 }
 0x1a0   : > { %v609_v46 = vsub.f32 %v601_v44, %v605_v43  ;;  %v586_v47 = vmul.f32 0.0078125, %v579_v45  ;;  %v1399_v43 = vld [vmem:[%s1577_s22 + $0x18] sm:$0xff]   ;;  %v1400_v44 = vld [vmem:[%s1577_s22 + $0x60] sm:$0xff]  }
 0x1a1   : > { %v596_v48 = vpop.xlane.xlu1 %595  ;;  %v1401_v45 = vld [vmem:[%s1577_s22 + $0x20] sm:$0xff]  }
 0x1a2   : > { %v613_v49 = vmax.f32 %v609_v46, 0.0  ;;  %v606_v50 = vmul.f32 %v586_v47, %v586_v47  ;;  %v602_v51 = vmul.f32 0.0078125, %v596_v48  ;;  %v618_v12 = vsub.f32 %v1607_v16, %v586_v47  ;;  %v1402_v46 = vld [vmem:[%s1577_s22 + $0x68] sm:$0xff]   ;;  %v1404_v48 = vld [vmem:[%s1577_s22 + $0x70] sm:$0xff]  }
 0x1a3   : > { %v581_v52 = vpop.xlane.xlu0 %580  ;;  %v1403_v47 = vld [vmem:[%s1577_s22 + $0x28] sm:$0xff]  }
 0x1a4   : > { %v621_v53 = vadd.f32 1e-05, %v613_v49  ;;  %v610_v54 = vsub.f32 %v602_v51, %v606_v50  ;;  %v587_v55 = vmul.f32 0.0078125, %v581_v52  ;;  %v1405_v49 = vld [vmem:[%s1577_s22 + $0x30] sm:$0xff]   ;;  %v1406_v50 = vld [vmem:[%s1577_s22 + $0x78] sm:$0xff]   ;;  %v675_v52 = vlaneseq }
 0x1a5   : > { %v583_v56 = vpop.xlane.xlu1 %582  ;;  %v1407_v51 = vld [vmem:[%s1577_s22 + $0x38] sm:$0xff]  }
 0x1a6   : > { %1408 = vrsqrt.f32 %v621_v53  ;;  %v614_v57 = vmax.f32 %v610_v54, 0.0  ;;  %v607_v58 = vmul.f32 %v587_v55, %v587_v55  ;;  %v588_v59 = vmul.f32 0.0078125, %v583_v56 }
 0x1a7   : > { %v598_v60 = vpop.xlane.xlu0 %597  ;;  %v619_v22 = vsub.f32 %v1614_v19, %v587_v55  ;;  %v676_v53 = vshrl.u32 %v675_v52, 7  ;;  %v673_v55 = vld [vmem:[%s1572_s15] sm:$0x3] }
 0x1a8   : > { %v622_v61 = vadd.f32 1e-05, %v614_v57  ;;  %v603_v62 = vmul.f32 0.0078125, %v598_v60  ;;  %v608_v0 = vmul.f32 %v588_v59, %v588_v59  ;;  %v620_v26 = vsub.f32 %v1617_v20, %v588_v59 }
 0x1a9   : > { %v600_v63 = vpop.xlane.xlu1 %599  ;;  %v677_v54 = vsub.s32 0, %v676_v53  ;;  %v681_v56 = vsub.s32 1, %v676_v53 }
 0x1aa   : > { %1410 = vrsqrt.f32 %v622_v61  ;;  %v611_v1 = vsub.f32 %v603_v62, %v607_v58  ;;  %v604_v2 = vmul.f32 0.0078125, %v600_v63 }
 0x1ab   : > { %v678_v57 = vrot.slane %v673_v55, %v677_v54  ;;  %v682_v58 = vrot.slane %v673_v55, %v681_v56 }
 0x1ac   : > { %v615_v3 = vmax.f32 %v611_v1, 0.0  ;;  %v612_v4 = vsub.f32 %v604_v2, %v608_v0 }
 0x1ae   : > { %v623_v5 = vadd.f32 1e-05, %v615_v3  ;;  %v616_v6 = vmax.f32 %v612_v4, 0.0 }
 0x1b0   : > { %v1409_v8 = vpop.eup %1408  ;;  %1412 = vrsqrt.f32 %v623_v5  ;;  %v624_v9 = vadd.f32 1e-05, %v616_v6 }
 0x1b1   : > { %v629_v10 = vmul.f32 %v1409_v8, %v617_v7 }
 0x1b2   : > { %1414 = vrsqrt.f32 %v624_v9 }
 0x1b3   : > { %v640_v17 = vmul.f32 %v1247_v11, %v629_v10 }
 0x1b4   : > { %v1411_v13 = vpop.eup %1410 }
 0x1b5   : > { %v630_v14 = vmul.f32 %v1411_v13, %v618_v12  ;;  %v651_v23 = vadd.f32 %v1248_v18, %v640_v17 }
 0x1b7   : > { %v641_v21 = vmul.f32 %v1247_v11, %v630_v14 }
 0x1b9   : > { %v652_v24 = vadd.f32 %v1248_v18, %v641_v21 }
 0x1ba   : > { %v1413_v25 = vpop.eup %1412 }
 0x1bb   : > { %v655_v27 = vpack.c.bf16 %v652_v24, %v651_v23  ;;  %v631_v28 = vmul.f32 %v1413_v25, %v619_v22 }
 0x1bc   : > { %v1415_v29 = vpop.eup %1414 }
 0x1bd   : > { %798 = vmatmul.mubr.bf16.vlgmr.msra.gmra.mrb[0].mxu0 %v655_v27  ;;  %v632_v30 = vmul.f32 %v1415_v29, %v620_v26  ;;  %v642_v31 = vmul.f32 %v1247_v11, %v631_v28 }
 0x1be   : > { %807 = vmatprep.mubr.bf16.mxu0 %v1471_v38  ;;  %v1396_v38 = vld [vmem:[%s1577_s22 + $0x50] sm:$0xff]  }
 0x1bf   : > { %v643_v32 = vmul.f32 %v1247_v11, %v632_v30  ;;  %v653_v33 = vadd.f32 %v1248_v18, %v642_v31  ;;  %1300 = vmatprep.subr.bf16.mxu1 %v1396_v38 }
 0x1c0   : > { %1301 = vmatpush3.bf16.msra.mxu1 %v1397_v41 }
 0x1c1   : > { %v654_v34 = vadd.f32 %v1248_v18, %v643_v32  ;;  %1302 = vmatprep.subr.bf16.mxu1 %v1398_v42 }
 0x1c3   : > { %v656_v35 = vpack.c.bf16 %v654_v34, %v653_v33 }
 0x1c4   : > { %1303 = vmatpush3.bf16.msra.mxu1 %v1399_v43 }
 0x1c5   : > { %808 = vmatmul.mubr.bf16.gmra.mrb[4].mxu0 %v656_v35  ;;  %1304 = vmatprep.subr.bf16.mxu1 %v1400_v44 }
 0x1c8   : > { %1305 = vmatpush3.bf16.msra.mxu1 %v1401_v45 }
 0x1c9   : > { %1306 = vmatprep.subr.bf16.mxu1 %v1402_v46 }
 0x1cc   : > { %1307 = vmatpush3.bf16.msra.mxu1 %v1403_v47 }
 0x1cd   : > { %1308 = vmatprep.subr.bf16.mxu1 %v1404_v48 }
 0x1d0   : > { %1309 = vmatpush3.bf16.msra.mxu1 %v1405_v49 }
 0x1d1   : > { %1310 = vmatprep.subr.bf16.mxu1 %v1406_v50 }
 0x1d4   : > { %1311 = vmatpush3.bf16.msra.mxu1 %v1407_v51 }
 0x290   : > { %v799_v59 = vpop.f32.mrb[0].mxu0 }
 0x291   : > { %v1674_v60 = vadd.f32 %v799_v59, %v678_v57  ;;  %v801_v61 = vpop.f32.mrb[1].mxu0 }
 0x292   : > { %v1676_v62 = vadd.f32 %v801_v61, %v682_v58  ;;  %v803_v63 = vpop.f32.mrb[2].mxu0 }
 0x293   : > { %v818_v0 = vmul.f32 %v1674_v60, %v1674_v60  ;;  %v1680_v1 = vadd.f32 %v803_v63, %v678_v57  ;;  %v805_v2 = vpop.f32.mrb[3].mxu0 }
 0x294   : > { %v819_v3 = vmul.f32 %v1676_v62, %v1676_v62  ;;  %v1684_v4 = vadd.f32 %v805_v2, %v682_v58 }
 0x295   : > { %v826_v5 = vmul.f32 %v818_v0, %v1674_v60  ;;  %v820_v6 = vmul.f32 %v1680_v1, %v1680_v1 }
 0x296   : > { %v827_v7 = vmul.f32 %v819_v3, %v1676_v62  ;;  %v821_v8 = vmul.f32 %v1684_v4, %v1684_v4 }
 0x297   : > { %v834_v9 = vmul.f32 0.044715, %v826_v5  ;;  %v828_v10 = vmul.f32 %v820_v6, %v1680_v1 }
 0x298   : > { %v835_v11 = vmul.f32 0.044715, %v827_v7  ;;  %v829_v12 = vmul.f32 %v821_v8, %v1684_v4  ;;  %v809_v13 = vpop.f32.mrb[4].mxu0 }
 0x299   : > { %v842_v14 = vadd.f32 %v834_v9, %v1674_v60  ;;  %v836_v17 = vmul.f32 0.044715, %v828_v10  ;;  %v1695_v18 = vadd.f32 %v809_v13, %v678_v57  ;;  %v811_v21 = vpop.f32.mrb[5].mxu0 }
 0x29a   : > { %v837_v22 = vmul.f32 0.044715, %v829_v12  ;;  %v1697_v23 = vadd.f32 %v811_v21, %v682_v58  ;;  %v813_v24 = vpop.f32.mrb[6].mxu0  ;;  %v843_v25 = vadd.f32 %v835_v11, %v1676_v62 }
 0x29b   : > { %v850_v26 = vmul.f32 0.7978846, %v842_v14  ;;  %v844_v27 = vadd.f32 %v836_v17, %v1680_v1  ;;  %v822_v28 = vmul.f32 %v1695_v18, %v1695_v18  ;;  %v1703_v29 = vadd.f32 %v813_v24, %v678_v57  ;;  %v815_v30 = vpop.f32.mrb[7].mxu0 }
 0x29c   : > { %v823_v31 = vmul.f32 %v1697_v23, %v1697_v23  ;;  %v1707_v32 = vadd.f32 %v815_v30, %v682_v58  ;;  %v845_v33 = vadd.f32 %v837_v22, %v1684_v4  ;;  %v851_v34 = vmul.f32 0.7978846, %v843_v25 }
 0x29d   : > { %1416 = vtanh.f32 %v850_v26  ;;  %v852_v35 = vmul.f32 0.7978846, %v844_v27  ;;  %v830_v36 = vmul.f32 %v822_v28, %v1695_v18  ;;  %v824_v37 = vmul.f32 %v1703_v29, %v1703_v29 }
 0x29e   : > { %v831_v39 = vmul.f32 %v823_v31, %v1697_v23  ;;  %v825_v40 = vmul.f32 %v1707_v32, %v1707_v32  ;;  %v853_v38 = vmul.f32 0.7978846, %v845_v33  ;;  %1418 = vtanh.f32 %v851_v34 }
 0x29f   : > { %1420 = vtanh.f32 %v852_v35  ;;  %v838_v41 = vmul.f32 0.044715, %v830_v36  ;;  %v832_v42 = vmul.f32 %v824_v37, %v1703_v29  ;;  %v1265_v36 = vld [vmem:[%s447_s26] ss:$0 sm:$0xff] }
 0x2a0   : > { %v839_v43 = vmul.f32 0.044715, %v831_v39  ;;  %v833_v44 = vmul.f32 %v825_v40, %v1707_v32  ;;  %1422 = vtanh.f32 %v853_v38 }
 0x2a1   : > { %v846_v45 = vadd.f32 %v838_v41, %v1695_v18  ;;  %v840_v46 = vmul.f32 0.044715, %v832_v42 }
 0x2a2   : > { %v847_v47 = vadd.f32 %v839_v43, %v1697_v23  ;;  %v841_v48 = vmul.f32 0.044715, %v833_v44 }
 0x2a3   : > { %v854_v49 = vmul.f32 0.7978846, %v846_v45  ;;  %v848_v50 = vadd.f32 %v840_v46, %v1703_v29 }
 0x2a4   : > { %v855_v51 = vmul.f32 0.7978846, %v847_v47  ;;  %v849_v52 = vadd.f32 %v841_v48, %v1707_v32 }
 0x2a5   : > { %1424 = vtanh.f32 %v854_v49  ;;  %v856_v53 = vmul.f32 0.7978846, %v848_v50 }
 0x2a6   : > { %1426 = vtanh.f32 %v855_v51  ;;  %v857_v54 = vmul.f32 0.7978846, %v849_v52 }
 0x2a7   : > { %v1417_v55 = vpop.eup %1416  ;;  %1428 = vtanh.f32 %v856_v53 }
 0x2a8   : > { %v1419_v56 = vpop.eup %1418  ;;  %1430 = vtanh.f32 %v857_v54  ;;  %v866_v57 = vadd.f32 1.0, %v1417_v55 }
 0x2a9   : > { %v1421_v58 = vpop.eup %1420  ;;  %v867_v59 = vadd.f32 1.0, %v1419_v56 }
 0x2aa   : > { %v1423_v61 = vpop.eup %1422  ;;  %v868_v63 = vadd.f32 1.0, %v1421_v58  ;;  %v874_v0 = vmul.f32 0.5, %v866_v57 }
 0x2ab   : > { %v869_v2 = vadd.f32 1.0, %v1423_v61  ;;  %v875_v3 = vmul.f32 0.5, %v867_v59 }
 0x2ac   : > { %v876_v5 = vmul.f32 0.5, %v868_v63  ;;  %v882_v7 = vmul.f32 %v874_v0, %v1674_v60 }
 0x2ad   : > { %v877_v6 = vmul.f32 0.5, %v869_v2  ;;  %v883_v10 = vmul.f32 %v875_v3, %v1676_v62 }
 0x2ae   : > { %v884_v8 = vmul.f32 %v876_v5, %v1680_v1 }
 0x2af   : > { %v1425_v9 = vpop.eup %1424  ;;  %v885_v11 = vmul.f32 %v877_v6, %v1684_v4 }
 0x2b0   : > { %v1427_v12 = vpop.eup %1426  ;;  %v890_v13 = vpack.c.bf16 %v884_v8, %v882_v7  ;;  %v870_v14 = vadd.f32 1.0, %v1425_v9 }
 0x2b1   : > { %v1429_v17 = vpop.eup %1428  ;;  %v891_v21 = vpack.c.bf16 %v885_v11, %v883_v10  ;;  %v871_v22 = vadd.f32 1.0, %v1427_v12 }
 0x2b2   : > { %v1431_v24 = vpop.eup %1430  ;;  %v872_v25 = vadd.f32 1.0, %v1429_v17  ;;  %v878_v26 = vmul.f32 0.5, %v870_v14 }
 0x2b3   : > { %1061 = vmatprep.mubr.bf16.mxu1 %v891_v21  ;;  %v873_v60 = vadd.f32 1.0, %v1431_v24  ;;  %v879_v27 = vmul.f32 0.5, %v871_v22 }
 0x2b4   : > { %1062 = vmatmul.mubr.bf16.vlgmr.msra.gmra.mrb[0].mxu1 %v890_v13  ;;  %v880_v1 = vmul.f32 0.5, %v872_v25  ;;  %v886_v62 = vmul.f32 %v878_v26, %v1695_v18 }
 0x2b5   : > { %v881_v28 = vmul.f32 0.5, %v873_v60  ;;  %v887_v30 = vmul.f32 %v879_v27, %v1697_v23 }
 0x2b6   : > { %v888_v4 = vmul.f32 %v880_v1, %v1703_v29 }
 0x2b7   : > { %v889_v31 = vmul.f32 %v881_v28, %v1707_v32 }
 0x2b8   : > { %v892_v33 = vpack.c.bf16 %v888_v4, %v886_v62 }
 0x2b9   : > { %v893_v34 = vpack.c.bf16 %v889_v31, %v887_v30 }
 0x2bb   : > { %1069 = vmatprep.mubr.bf16.mxu1 %v893_v34 }
 0x2bc   : > { %1070 = vmatmul.mubr.bf16.gmra.mrb[4].mxu1 %v892_v33 }
 0x387   : > { %v1312_v35 = vpop.f32.mrb[0].mxu1 }
 0x388   : > { %v1313_v37 = vpop.f32.mrb[1].mxu1 }
 0x389   : > { %v1314_v18 = vadd.f32 %v1313_v37, %v1312_v35  ;;  %v1315_v39 = vpop.f32.mrb[2].mxu1 }
 0x38a   : > { %v1316_v29 = vpop.f32.mrb[3].mxu1 }
 0x38b   : > { %v1064_v40 = vadd.f32 %v1314_v18, %v1265_v36  ;;  %v1317_v23 = vadd.f32 %v1316_v29, %v1315_v39 }
 0x38d   : > { %v1078_v32 = vadd.f32 %v1064_v40, %v1605_v15  ;;  %v1067_v38 = vadd.f32 %v1317_v23, %v1265_v36 }
 0x38f   : > { %1082 = vst [vmem:[#allocation2] sm:$0xff] %v1078_v32  ;;  %v1079_v41 = vadd.f32 %v1067_v38, %v1607_v16  ;;  %v1318_v42 = vpop.f32.mrb[4].mxu1  ;;  %1093 = vst [vmem:[%s1092_s16] sm:$0xff] (!%p1282_p11), %v1078_v32 }
 0x390   : > { %v1319_v43 = vpop.f32.mrb[5].mxu1 }
 0x391   : > { %1083 = vst [vmem:[#allocation2 + $0x8] sm:$0xff] %v1079_v41  ;;  %v1320_v44 = vadd.f32 %v1319_v43, %v1318_v42  ;;  %v1321_v45 = vpop.f32.mrb[6].mxu1  ;;  %1094 = vst [vmem:[%s1092_s16 + $0x8] sm:$0xff] (!%p1282_p11), %v1079_v41 }
 0x392   : > { %v1322_v46 = vpop.f32.mrb[7].mxu1 }
 0x393   : > { %v1072_v47 = vadd.f32 %v1320_v44, %v1265_v36  ;;  %v1323_v48 = vadd.f32 %v1322_v46, %v1321_v45  ;;  %1090 = sbr.rel (%p1282_p11) target bundleno = 922 (0x39a), region = 64 }
 0x395   : > { %v1080_v49 = vadd.f32 %v1072_v47, %v1614_v19  ;;  %v1075_v50 = vadd.f32 %v1323_v48, %v1265_v36 }
 0x397   : > { %1084 = vst [vmem:[#allocation2 + $0x10] sm:$0xff] %v1080_v49  ;;  %v1081_v51 = vadd.f32 %v1075_v50, %v1617_v20  ;;  %1095 = vst [vmem:[%s1092_s16 + $0x10] sm:$0xff] (!%p1282_p11), %v1080_v49 }
 0x399   : > { %1085 = vst [vmem:[#allocation2 + $0x18] sm:$0xff] %v1081_v51  ;;  %1096 = vst [vmem:[%s1092_s16 + $0x18] sm:$0xff] (!%p1282_p11), %v1081_v51 }
 0x39a PF: > { %s26_s20 = sadd.s32 1, %s1468_s20   ;;  %s1768_s18 = smov %s1464_s19 }
 0x39b   : > { %p23_p12 = scmp.ge.s32.totalorder %s26_s20, 6   ;;  %s1769_s19 = smov %s1771_s0 }
 0x39d   :  { %25 = sbr.rel (!%p23_p12) target bundleno = 17 (0x11), region = 113 }

</bundles_post_ra>
